<compile_context>
chip_gen: v6e
topology: v6e:2x2x1
jax: 0.10.0
libtpu: 0.0.40
codegen_flags: <defaults>
</compile_context>

<pallas_src>
import functools

import jax
import jax.numpy as jnp
from jax.experimental import pallas as pl
from jax.experimental.pallas import tpu as pltpu

_LANE = 128
_SUBLANE = 8


def _vmem_capacity_bytes():
    try:
        return int(pltpu.get_tpu_info().vmem_capacity_bytes)
    except Exception:
        return 64 * 1024 * 1024  # conservative (v7x-sized) fallback


def _round_up(x, m):
    return pl.cdiv(x, m) * m


# ----------------------------------------------------------------------------
# Fused path: the whole batch for a strip of columns lives in VMEM.
# ----------------------------------------------------------------------------
def _actnorm_fused_kernel(x_ref, z_ref, s_ref, t_ref):
    """One (N, tile_d) column strip: full-batch stats + affine apply, per column."""
    x = x_ref[...].astype(jnp.float32)                       # (N, tile_d)
    n = x.shape[0]

    mean = jnp.mean(x, axis=0, keepdims=True)                # (1, tile_d)
    var = jnp.sum((x - mean) ** 2, axis=0, keepdims=True) / jnp.float32(n - 1)

    s_raw = -0.5 * jnp.log(var)                              # == -log(unbiased std)
    s = jnp.where(jnp.isfinite(s_raw), s_raw, 0.0)           # torch zeroes inf / nan
    es = jnp.exp(s)                                          # exp after fixup (exp(0)=1)
    t = -mean * es                                           # == -mean(x*es); es per-column

    z_ref[...] = (x * es + t).astype(z_ref.dtype)
    s_ref[...] = s.astype(s_ref.dtype)
    t_ref[...] = t.astype(t_ref.dtype)


# ----------------------------------------------------------------------------
# Large-N fallback: two passes over x (per-column stats sweep, then affine apply).
# ----------------------------------------------------------------------------
def _colstats_kernel(x_ref, sum_ref, sq_ref, *, n_rows, tile_n):
    """Accumulate per-column sum(x) and sum(x*x) over the (arbitrary) N grid axis."""
    j = pl.program_id(1)

    @pl.when(j == 0)
    def _():
        sum_ref[...] = jnp.zeros_like(sum_ref)
        sq_ref[...] = jnp.zeros_like(sq_ref)

    x = x_ref[...].astype(jnp.float32)                       # (tile_n, tile_d)
    row = j * tile_n + jax.lax.broadcasted_iota(jnp.int32, x.shape, 0)
    x = jnp.where(row < n_rows, x, 0.0)                      # mask boundary garbage rows
    sum_ref[...] += jnp.sum(x, axis=0, keepdims=True)
    sq_ref[...] += jnp.sum(x * x, axis=0, keepdims=True)


def _apply_kernel(x_ref, es_ref, t_ref, z_ref):
    """z = x * exp(s) + t (this is also the post-init AffineConstantFlow forward)."""
    z_ref[...] = (x_ref[...].astype(jnp.float32) * es_ref[...] + t_ref[...]).astype(z_ref.dtype)


def _actnorm_two_pass(x, *, strip_budget, vmem_cap):
    # TODO(synk): stats use the single-pass E[x^2]-E[x]^2 form; switch to a centered
    # two-sweep variance if the tolerance budget for very large-mean data requires it.
    N, D = x.shape
    tile_d = D if D <= _LANE else min(4 * _LANE, (D // _LANE) * _LANE)
    tile_n = (strip_budget // (16 * tile_d)) // _SUBLANE * _SUBLANE
    tile_n = max(_SUBLANE, min(tile_n, max(_SUBLANE, (N // _SUBLANE) * _SUBLANE)))
    grid = (pl.cdiv(D, tile_d), pl.cdiv(N, tile_n))

    xsum, xsq = pl.pallas_call(
        functools.partial(_colstats_kernel, n_rows=N, tile_n=tile_n),
        out_shape=(jax.ShapeDtypeStruct((1, D), jnp.float32),
                   jax.ShapeDtypeStruct((1, D), jnp.float32)),
        grid=grid,
        in_specs=[pl.BlockSpec((tile_n, tile_d), lambda i, j: (j, i))],
        out_specs=(pl.BlockSpec((1, tile_d), lambda i, j: (0, i)),
                   pl.BlockSpec((1, tile_d), lambda i, j: (0, i))),
        compiler_params=pltpu.CompilerParams(
            dimension_semantics=("parallel", "arbitrary"),
            vmem_limit_bytes=vmem_cap),
    )(x)

    # Tiny (1, D) math stays in plain JAX (lane-width-1-ish work is cheaper outside).
    mean = xsum / N
    var = jnp.maximum(xsq - N * mean * mean, 0.0) / max(N - 1, 1)
    s_raw = -0.5 * jnp.log(var)
    s = jnp.where(jnp.isfinite(s_raw), s_raw, 0.0)
    es = jnp.exp(s)
    t = -mean * es

    z = pl.pallas_call(
        _apply_kernel,
        out_shape=jax.ShapeDtypeStruct((N, D), x.dtype),
        grid=grid,
        in_specs=[pl.BlockSpec((tile_n, tile_d), lambda i, j: (j, i)),
                  pl.BlockSpec((1, tile_d), lambda i, j: (0, i)),
                  pl.BlockSpec((1, tile_d), lambda i, j: (0, i))],
        out_specs=pl.BlockSpec((tile_n, tile_d), lambda i, j: (j, i)),
        compiler_params=pltpu.CompilerParams(
            dimension_semantics=("parallel", "parallel"),
            vmem_limit_bytes=vmem_cap),
    )(x, es, t)
    return z, s, t


# ----------------------------------------------------------------------------
# Wrapper (== ActNorm.forward(x, logDetJ=True) on the very first batch).
# ----------------------------------------------------------------------------
def actnorm_forward(x):
    """Returns (z, log_det, s, t): z (N, D), log_det (N,), s/t (1, D) float32."""
    x = jnp.asarray(x)
    N, D = x.shape

    cap = _vmem_capacity_bytes()
    strip_budget = cap // 2          # accounted double-buffered f32 in+out strips
    vmem_cap = (cap * 3) // 4        # >= 25% headroom below physical VMEM

    # Fused path needs a full-batch (N, tile_d) strip (double-buffered in + out:
    # 16 B per element) to fit the strip budget even at the minimum 128-lane width.
    if 16 * N * min(D, _LANE) <= strip_budget:
        if D <= _LANE:
            tile_d = D                                        # full-dim block, no padding games
        else:
            tile_d = (strip_budget // (16 * N)) // _LANE * _LANE
            tile_d = max(_LANE, min(tile_d, (D // _LANE) * _LANE))
            if D >= 8 * _LANE:
                # v7x megacore: keep >= 2 column strips so both TCs get work (no-op v5e/v6e).
                tile_d = min(tile_d, _round_up(pl.cdiv(D, 2), _LANE))
        grid_d = pl.cdiv(D, tile_d)

        z, s, t = pl.pallas_call(
            _actnorm_fused_kernel,
            out_shape=(jax.ShapeDtypeStruct((N, D), x.dtype),
                       jax.ShapeDtypeStruct((1, D), jnp.float32),
                       jax.ShapeDtypeStruct((1, D), jnp.float32)),
            grid=(grid_d,),
            in_specs=[pl.BlockSpec((N, tile_d), lambda i: (0, i))],
            out_specs=(pl.BlockSpec((N, tile_d), lambda i: (0, i)),
                       pl.BlockSpec((1, tile_d), lambda i: (0, i)),
                       pl.BlockSpec((1, tile_d), lambda i: (0, i))),
            compiler_params=pltpu.CompilerParams(
                dimension_semantics=("parallel",),
                vmem_limit_bytes=vmem_cap),
        )(x)
    else:
        z, s, t = _actnorm_two_pass(x, strip_budget=strip_budget, vmem_cap=vmem_cap)

    log_det = jnp.broadcast_to(jnp.sum(s, axis=1), (N,))
    return z, log_det, s, t


if __name__ == "__main__":
    key = jax.random.PRNGKey(0)
    N, D = 8, 32                      # (batch, dim) -- ActNorm operates on 2-D inputs
    x = jax.random.normal(key, (N, D), dtype=jnp.float32) * 2.5 + 1.0
    # Exercise the std==0 -> inf fixup path with a constant column.  1.5 sums exactly in
    # any f32 reduction order, so the kernel's tree reduction and the host reference both
    # get var == 0 exactly and take the same fixup branch (an arbitrary constant like 1.7
    # makes "var == 0" reduction-order dependent, which tripped the previous version).
    x = x.at[:, 3].set(1.5)

    z, log_det, s, t = actnorm_forward(x)
    jax.block_until_ready((z, log_det, s, t))

    # Pure-JAX reference mirroring the PyTorch ActNorm first-forward path.
    mean_ref = jnp.mean(x, axis=0, keepdims=True)
    var_ref = jnp.sum((x - mean_ref) ** 2, axis=0, keepdims=True) / (N - 1)
    s_ref = -jnp.log(jnp.sqrt(var_ref))                      # -log(unbiased std)
    s_ref = jnp.where(jnp.isinf(s_ref) | jnp.isnan(s_ref), 0.0, s_ref)
    t_ref = -jnp.mean(x * jnp.exp(s_ref), axis=0, keepdims=True)
    z_ref = x * jnp.exp(s_ref) + t_ref
    ld_ref = jnp.broadcast_to(jnp.sum(s_ref, axis=1), (N,))

    assert jnp.allclose(s, s_ref, rtol=1e-4, atol=1e-4), "s mismatch"
    assert jnp.allclose(t, t_ref, rtol=1e-4, atol=1e-4), "t mismatch"
    assert jnp.allclose(z, z_ref, rtol=1e-4, atol=1e-4), "z mismatch"
    assert jnp.allclose(log_det, ld_ref, rtol=1e-4, atol=1e-4), "log_det mismatch"

    print("KERNEL_OK")
</pallas_src>

<mosaic_0001>
module attributes {stable_mosaic.version = 11 : i64} {
  func.func @_actnorm_fused_kernel(%arg0: i32, %arg1: memref<8x32xf32, #tpu.memory_space<vmem>>, %arg2: memref<8x32xf32, #tpu.memory_space<vmem>>, %arg3: memref<1x32xf32, #tpu.memory_space<vmem>>, %arg4: memref<1x32xf32, #tpu.memory_space<vmem>>) attributes {dimension_semantics = [#tpu.dimension_semantics<parallel>], iteration_bounds = array<i64: 1>, scalar_prefetch = 0 : i64, scratch_operands = 0 : i64, tpu.core_type = #tpu.core_type<tc>, window_params = [{transform_indices = @transform_0, window_bounds = array<i64: 8, 32>}, {transform_indices = @transform_1, window_bounds = array<i64: 8, 32>}, {transform_indices = @transform_2, window_bounds = array<i64: 1, 32>}, {transform_indices = @transform_3, window_bounds = array<i64: 1, 32>}]} {
    %c0 = arith.constant 0 : index
    %c0_0 = arith.constant 0 : index
    %0 = vector.load %arg1[%c0, %c0_0] : memref<8x32xf32, #tpu.memory_space<vmem>>, vector<8x32xf32>
    %cst = arith.constant dense<0.000000e+00> : vector<32xf32>
    %1 = vector.multi_reduction <add>, %0, %cst [0] : vector<8x32xf32> to vector<32xf32>
    %2 = vector.shape_cast %1 : vector<32xf32> to vector<1x32xf32>
    %cst_1 = arith.constant 8.000000e+00 : f32
    %3 = vector.broadcast %cst_1 : f32 to vector<1x32xf32>
    %4 = arith.divf %2, %3 : vector<1x32xf32>
    %5 = vector.broadcast %4 : vector<1x32xf32> to vector<8x32xf32>
    %6 = arith.subf %0, %5 : vector<8x32xf32>
    %7 = arith.mulf %6, %6 : vector<8x32xf32>
    %cst_2 = arith.constant dense<0.000000e+00> : vector<32xf32>
    %8 = vector.multi_reduction <add>, %7, %cst_2 [0] : vector<8x32xf32> to vector<32xf32>
    %9 = vector.shape_cast %8 : vector<32xf32> to vector<1x32xf32>
    %cst_3 = arith.constant 7.000000e+00 : f32
    %10 = vector.broadcast %cst_3 : f32 to vector<1x32xf32>
    %11 = arith.divf %9, %10 : vector<1x32xf32>
    %12 = math.log %11 : vector<1x32xf32>
    %cst_4 = arith.constant -5.000000e-01 : f32
    %13 = vector.broadcast %cst_4 : f32 to vector<1x32xf32>
    %14 = arith.mulf %13, %12 : vector<1x32xf32>
    %15 = tpu.weird %14 : vector<1x32xf32> -> vector<1x32xi1>
    %cst_5 = arith.constant dense<true> : vector<1x32xi1>
    %16 = arith.xori %15, %cst_5 : vector<1x32xi1>
    %cst_6 = arith.constant 0.000000e+00 : f32
    %17 = vector.broadcast %cst_6 : f32 to vector<1x32xf32>
    %18 = arith.select %16, %14, %17 : vector<1x32xi1>, vector<1x32xf32>
    %19 = math.exp %18 : vector<1x32xf32>
    %cst_7 = arith.constant 0.000000e+00 : f32
    %20 = vector.broadcast %cst_7 : f32 to vector<1x32xf32>
    %21 = arith.subf %20, %4 : vector<1x32xf32>
    %22 = arith.mulf %21, %19 : vector<1x32xf32>
    %23 = vector.broadcast %19 : vector<1x32xf32> to vector<8x32xf32>
    %24 = arith.mulf %0, %23 : vector<8x32xf32>
    %25 = vector.broadcast %22 : vector<1x32xf32> to vector<8x32xf32>
    %26 = arith.addf %24, %25 : vector<8x32xf32>
    %c0_8 = arith.constant 0 : index
    %c0_9 = arith.constant 0 : index
    %27 = vector.load %arg2[%c0_8, %c0_9] : memref<8x32xf32, #tpu.memory_space<vmem>>, vector<8x32xf32>
    tpu.vector_store %arg2[%c0_8, %c0_9], %26 {strides = array<i32>} : memref<8x32xf32, #tpu.memory_space<vmem>>, vector<8x32xf32>,
    %c0_10 = arith.constant 0 : index
    %c0_11 = arith.constant 0 : index
    %28 = vector.load %arg3[%c0_10, %c0_11] : memref<1x32xf32, #tpu.memory_space<vmem>>, vector<1x32xf32>
    tpu.vector_store %arg3[%c0_10, %c0_11], %18 {strides = array<i32>} : memref<1x32xf32, #tpu.memory_space<vmem>>, vector<1x32xf32>,
    %c0_12 = arith.constant 0 : index
    %c0_13 = arith.constant 0 : index
    %29 = vector.load %arg4[%c0_12, %c0_13] : memref<1x32xf32, #tpu.memory_space<vmem>>, vector<1x32xf32>
    tpu.vector_store %arg4[%c0_12, %c0_13], %22 {strides = array<i32>} : memref<1x32xf32, #tpu.memory_space<vmem>>, vector<1x32xf32>,
    return
  }
  func.func @transform_0(%arg0: i32) -> (i32, i32) {
    %c0_i32 = arith.constant 0 : i32
    %c0_i32_0 = arith.constant 0 : i32
    return %c0_i32, %arg0 : i32, i32
  }
  func.func @transform_1(%arg0: i32) -> (i32, i32) {
    %c0_i32 = arith.constant 0 : i32
    %c0_i32_0 = arith.constant 0 : i32
    return %c0_i32, %arg0 : i32, i32
  }
  func.func @transform_2(%arg0: i32) -> (i32, i32) {
    %c0_i32 = arith.constant 0 : i32
    %c0_i32_0 = arith.constant 0 : i32
    return %c0_i32, %arg0 : i32, i32
  }
  func.func @transform_3(%arg0: i32) -> (i32, i32) {
    %c0_i32 = arith.constant 0 : i32
    %c0_i32_0 = arith.constant 0 : i32
    return %c0_i32, %arg0 : i32, i32
  }
}

</mosaic_0001>

<bundles_post_ra>
// kernel: tpu_custom_call.1
= control target key start
LH: loop header
LB: loop body
LE: loop exit
PB: predicated region body
PF: predicated region fallthrough
CT: control target
= control target key end

     0   :  { %9 = vsyncpa [#allocation3], 0  ;;  %s242_s0 = inlined_call_operand.hbm [shape: f32[8,32], index: 0, kind: input, shape index: {}]   ;;  %s243_s1 = inlined_call_operand.hbm [shape: f32[8,32], index: 1, kind: output, shape index: {0}]   ;;  %s244_s2 = inlined_call_operand.hbm [shape: f32[1,32], index: 2, kind: output, shape index: {1}]   ;;  %s245_s3 = inlined_call_operand.hbm [shape: f32[1,32], index: 3, kind: output, shape index: {2}]  }
   0x1   :  { %10 = vsyncpa [#allocation4], 0 }
   0x2   :  { %11 = vsyncpa [#allocation7], 0  ;;  %s200_s12 = smov [#allocation2]  }
   0x3   :  { %s18_s13 = sshll.u32 %s200_s12, 4  ;;  %s19_s13 = int_to_ptr.vmem [resolvable:$true] %s18_s13 }
   0x4   :  { %s122_s14 = scalar_lea.vmem %s19_s13, 128  ;;  %p127_p1 = scmp.lt.s32.totalorder %s19_s13, %s19_s13 }
   0x5   :  { %p123_p0 = scmp.ne.s32.totalorder %s19_s13, %s122_s14  ;;  %p128_p2 = scmp.lt.s32.totalorder %s122_s14, %s122_s14 }
   0x7   :  { %p129_p3 = por %p128_p2, %p127_p1 }
   0x9   :  { %p130_p4 = pnand %p129_p3, %p123_p0 }
   0xb   :  { %133 = shalt.err (!%p130_p4)
}
   0xc   :  { %21 = dma.hbm_to_vmem [thread:$0]  %s242_s0, 128, %s19_s13, [#allocation3]  }
   0xd   :  { %194 = dma.done.wait [#allocation3], 128  }
   0xe   :  { %195 = vsyncadd [#allocation3], 4294967168  ;;  %vm26_vm0 = vcmask 261120   ;;  %v25_v0 = vld [vmem:[#allocation2] sm:$0xff]  ;;  %s201_s0 = smov [#allocation6]   ;;  %vm60_vm2 = vcmask 253952  }
   0xf   :  { %v27_v1 = vsel %vm26_vm0, %v25_v0, 0.0  ;;  %s79_s17 = sshll.u32 %s201_s0, 4  ;;  %vm202_vm3 = vmmov 1   ;;  %s80_s17 = int_to_ptr.vmem [resolvable:$true] %s79_s17 }
  0x10   :  { %v28_v2 = vrot.slane %v27_v1, 4  ;;  %s134_s18 = scalar_lea.vmem %s80_s17, 16  ;;  %s138_s19 = scalar_lea.vmem %s80_s17, 32 }
  0x11   :  { %p135_p5 = scmp.ne.s32.totalorder %s80_s17, %s134_s18  ;;  %p139_p6 = scmp.lt.s32.totalorder %s80_s17, %s80_s17 }
  0x12   :  { %v29_v3 = vadd.f32 %v28_v2, %v27_v1  ;;  %p140_p7 = scmp.lt.s32.totalorder %s138_s19, %s134_s18 }
  0x14   :  { %v30_v4 = vrot.slane %v29_v3, 2  ;;  %p141_p8 = por %p140_p7, %p139_p6 }
  0x16   :  { %v31_v5 = vadd.f32 %v30_v4, %v29_v3  ;;  %p142_p9 = pnand %p141_p8, %p135_p5 }
  0x18   :  { %v32_v6 = vrot.slane %v31_v5, 1 }
  0x1a   :  { %v33_v7 = vadd.f32 %v32_v6, %v31_v5 }
  0x1c   :  { %v35_v8 = vmul.f32 0.125, %v33_v7 }
  0x1e   :  { %v36_v9 = vsub.f32 %v25_v0, %v35_v8 }
  0x20   :  { %v37_v10 = vmul.f32 %v36_v9, %v36_v9 }
  0x22   :  { %v38_v11 = vsel %vm26_vm0, %v37_v10, 0.0 }
  0x23   :  { %v39_v12 = vrot.slane %v38_v11, 4 }
  0x25   :  { %v40_v13 = vadd.f32 %v39_v12, %v38_v11 }
  0x27   :  { %v41_v14 = vrot.slane %v40_v13, 2 }
  0x29   :  { %v42_v15 = vadd.f32 %v41_v14, %v40_v13 }
  0x2b   :  { %v43_v16 = vrot.slane %v42_v15, 1 }
  0x2d   :  { %v44_v17 = vadd.f32 %v43_v16, %v42_v15 }
  0x2f   :  { %v46_v18 = vmul.f32 0.14285715, %v44_v17 }
  0x31   :  { %110 = vlog2.f32 %v46_v18 }
  0x3e   :  { %v111_v19 = vpop.eup %110 }
  0x3f   :  { %v48_v20 = vmul.f32 0.6931472, %v111_v19 }
  0x41   :  { %v49_v21 = vmul.f32 -0.5, %v48_v20 }
  0x43   :  { %vm50_vm1 = vweird.f32 %v49_v21 }
  0x44   :  { %vm51_vm4 = vmxor %vm50_vm1, %vm202_vm3 }
  0x45   :  { %v52_v22 = vsel %vm51_vm4, %v49_v21, 0.0 }
  0x46   :  { %v53_v23 = vmul.f32 1.442695, %v52_v22  ;;  %61 = vst.msk [vmem:[#allocation6] sm:$0x1] %vm60_vm2, %v52_v22 }
  0x47   :  { %145 = shalt.err (!%p142_p9)
}
  0x48   :  { %82 = dma.vmem_to_hbm [thread:$0]  %s80_s17, 16, %s244_s2, [#allocation7]   ;;  %112 = vpow2.f32 %v53_v23  ;;  %v55_v24 = vsub.f32 0.0, %v35_v8 }
  0x49   :  { %s203_s22 = smov [#allocation8]   ;;  %s204_s24 = smov [#allocation5]  }
  0x4a   :  { %s89_s23 = sshll.u32 %s203_s22, 4  ;;  %s69_s25 = sshll.u32 %s204_s24, 4  ;;  %s90_s23 = int_to_ptr.vmem [resolvable:$true] %s89_s23  ;;  %s70_s25 = int_to_ptr.vmem [resolvable:$true] %s69_s25 }
  0x4b   :  { %s154_s26 = scalar_lea.vmem %s90_s23, 16  ;;  %s158_s27 = scalar_lea.vmem %s90_s23, 32 }
  0x4c   :  { %p155_p10 = scmp.ne.s32.totalorder %s90_s23, %s154_s26  ;;  %p159_p11 = scmp.lt.s32.totalorder %s90_s23, %s90_s23 }
  0x4d   :  { %p160_p12 = scmp.lt.s32.totalorder %s158_s27, %s154_s26 }
  0x4f   :  { %p161_p13 = por %p160_p12, %p159_p11 }
  0x51   :  { %p162_p0 = pnand %p161_p13, %p155_p10 }
  0x55   :  { %v113_v25 = vpop.eup %112 }
  0x56   :  { %v56_v26 = vmul.f32 %v113_v25, %v55_v24  ;;  %v57_v27 = vmul.f32 %v113_v25, %v25_v0 }
  0x58   :  { %v58_v28 = vadd.f32 %v57_v27, %v56_v26  ;;  %62 = vst.msk [vmem:[#allocation8] sm:$0x1] %vm60_vm2, %v56_v26 }
  0x59   :  { %165 = shalt.err (!%p162_p0)
}
  0x5a   :  { %92 = dma.vmem_to_hbm [thread:$0]  %s90_s23, 16, %s245_s3, [#allocation7]   ;;  %59 = vst.msk [vmem:[#allocation5] sm:$0xff] %vm26_vm0, %v58_v28 }
  0x5b   :  { %s174_s29 = scalar_lea.vmem %s70_s25, 128  ;;  %p179_p2 = scmp.lt.s32.totalorder %s70_s25, %s70_s25 }
  0x5c   :  { %p175_p1 = scmp.ne.s32.totalorder %s70_s25, %s174_s29  ;;  %p180_p3 = scmp.lt.s32.totalorder %s174_s29, %s174_s29 }
  0x5e   :  { %p181_p4 = por %p180_p3, %p179_p2 }
  0x60   :  { %p182_p5 = pnand %p181_p4, %p175_p1 }
  0x62   :  { %185 = shalt.err (!%p182_p5)
}
  0x63   :  { %72 = dma.vmem_to_hbm [thread:$0]  %s70_s25, 128, %s243_s1, [#allocation4]  }
  0x64   :  { %196 = dma.done.wait [#allocation4], 128  }
  0x65   :  { %197 = vsyncadd [#allocation4], 4294967168 }
  0x66   :  { %198 = dma.done.wait [#allocation7], 32  }
  0x67   :  { %199 = vsyncadd [#allocation7], 4294967264 }
  0x68   :  { %102 = vsyncpa [#allocation3], 1 }
  0x69   :  { %103 = vsyncpa [#allocation4], 1 }
  0x6a   :  { %104 = vsyncpa [#allocation7], 1 }

</bundles_post_ra>
